<compile_context>
chip_gen: v7x
topology: tpu7x:2x2x1
jax: 0.10.0
libtpu: 0.0.40
codegen_flags: <defaults>
</compile_context>

<pallas_src>
import functools

import jax
import jax.numpy as jnp
from jax.experimental import pallas as pl
from jax.experimental.pallas import tpu as pltpu


# ---------------------------------------------------------------------------
# small helpers
# ---------------------------------------------------------------------------
def _round_up(a, m):
    return ((a + m - 1) // m) * m


def _cdiv(a, b):
    return (a + b - 1) // b


def _pick_row_tile(n_rows, cols, n_streams, bytes_per_el=4, budget=24 << 20):
    """Largest row tile (multiple of 8, <=1024) whose double-buffered streams
    fit in `budget` bytes of VMEM."""
    per_row = n_streams * 2 * cols * bytes_per_el          # double-buffered
    t = budget // max(per_row, 1)
    t = max(8, min(1024, (t // 8) * 8))
    t = min(t, _round_up(max(n_rows, 1), 8))
    return t


def _pick_cols(total):
    """Lane-dense column count (multiple of 128) for a flattened elementwise op."""
    cols = 2048
    while cols > 128 and total < cols * 8:
        cols //= 2
    return cols


_VMEM_LIMIT = 64 * 1024 * 1024  # safe on v5e/v6e (128 MiB phys) and v7x (64 MiB)


# ---------------------------------------------------------------------------
# Kernel 1: LayerNormalization (torch-style: unbiased std, eps added to std)
# ---------------------------------------------------------------------------
def _layernorm_kernel(x_ref, alpha_ref, bias_ref, o_ref, *, eps):
    x = x_ref[...].astype(jnp.float32)                      # (TR, F)
    n = x.shape[-1]
    mean = jnp.mean(x, axis=-1, keepdims=True)
    centered = x - mean
    # torch.Tensor.std defaults to the unbiased estimator (divisor N-1).
    var = jnp.sum(centered * centered, axis=-1, keepdims=True) * (1.0 / (n - 1))
    inv = 1.0 / (jnp.sqrt(var) + eps)                       # (TR, 1)
    y = centered * (alpha_ref[...] * inv) + bias_ref[...]
    o_ref[...] = y.astype(o_ref.dtype)


def layer_norm(x2d, alpha, bias, *, eps=1e-6):
    rows, feat = x2d.shape
    row_tile = _pick_row_tile(rows, feat, n_streams=2)      # x in + out
    padded_rows = _round_up(rows, row_tile)
    x_p = x2d if padded_rows == rows else jnp.pad(x2d, ((0, padded_rows - rows), (0, 0)))

    alpha2d = alpha.reshape(1, feat).astype(jnp.float32)
    bias2d = bias.reshape(1, feat).astype(jnp.float32)

    row_spec = pl.BlockSpec((row_tile, feat), lambda i: (i, 0))
    par_spec = pl.BlockSpec((1, feat), lambda i: (0, 0))

    out = pl.pallas_call(
        functools.partial(_layernorm_kernel, eps=eps),
        out_shape=jax.ShapeDtypeStruct((padded_rows, feat), x2d.dtype),
        grid=(padded_rows // row_tile,),
        in_specs=[row_spec, par_spec, par_spec],
        out_specs=row_spec,
        compiler_params=pltpu.CompilerParams(
            dimension_semantics=("parallel",),
            vmem_limit_bytes=_VMEM_LIMIT),
    )(x_p, alpha2d, bias2d)

    return out if padded_rows == rows else out[:rows]


# ---------------------------------------------------------------------------
# Kernel 2: residual add + dropout (training mode)
#   keep mask = (uint32 random bits >= threshold), threshold = round(p * 2^32)
# ---------------------------------------------------------------------------
def _residual_dropout_kernel(bits_ref, x_ref, sub_ref, o_ref, *, threshold, scale):
    keep = bits_ref[...] >= jnp.uint32(threshold)
    x = x_ref[...].astype(jnp.float32)
    sub = sub_ref[...].astype(jnp.float32)
    out = x + jnp.where(keep, sub * jnp.float32(scale), jnp.float32(0.0))
    o_ref[...] = out.astype(o_ref.dtype)


def residual_dropout_add(x2d, sub2d, *, p, key, training):
    rows, feat = x2d.shape
    dtype = x2d.dtype
    sub2d = sub2d.astype(dtype)

    # Eval / p==0: plain JAX add (XLA fuses it; no extra kernel launch or HBM pass).
    if (not training) or p <= 0.0:
        return x2d + sub2d
    # p>=1: everything dropped.
    if p >= 1.0:
        return x2d

    # TODO(synk): PyTorch's dropout RNG stream cannot be bit-reproduced; the mask
    # is built from JAX uint32 random bits generated outside the kernel.
    total = rows * feat
    cols = _pick_cols(total)                                 # lane-dense last dim
    n_rows = _cdiv(total, cols)
    row_tile = _pick_row_tile(n_rows, cols, n_streams=4)     # bits + x + sub + out
    padded_rows = _round_up(n_rows, row_tile)
    padded = padded_rows * cols

    xf = jnp.pad(x2d.reshape(-1), (0, padded - total)).reshape(padded_rows, cols)
    sf = jnp.pad(sub2d.reshape(-1), (0, padded - total)).reshape(padded_rows, cols)
    bits = jax.random.bits(key, (padded_rows, cols), dtype=jnp.uint32)

    threshold = min(int(round(p * (2 ** 32))), 2 ** 32 - 1)
    scale = 1.0 / (1.0 - p)

    spec = pl.BlockSpec((row_tile, cols), lambda i: (i, 0))

    out = pl.pallas_call(
        functools.partial(_residual_dropout_kernel, threshold=threshold, scale=scale),
        out_shape=jax.ShapeDtypeStruct((padded_rows, cols), dtype),
        grid=(padded_rows // row_tile,),
        in_specs=[spec, spec, spec],
        out_specs=spec,
        input_output_aliases={2: 0},                         # reuse sublayer buffer
        compiler_params=pltpu.CompilerParams(
            dimension_semantics=("parallel",),
            vmem_limit_bytes=_VMEM_LIMIT),
    )(bits, xf, sf)

    return out.reshape(-1)[:total].reshape(rows, feat)


# ---------------------------------------------------------------------------
# ResidualConnection forward
# ---------------------------------------------------------------------------
def residual_connection(x, sublayer, alpha, bias, *, dropout_p, eps=1e-6,
                        training=False, rng_key=None):
    """x: (B, S, F); sublayer: arbitrary JAX callable mapping (B,S,F)->(B,S,F)."""
    B, S, F = x.shape
    x2d = x.reshape(B * S, F)
    normed = layer_norm(x2d, alpha, bias, eps=eps)                   # Pallas kernel
    sub = sublayer(normed.reshape(B, S, F)).reshape(B * S, F)        # user callable (glue)
    if training and dropout_p > 0.0 and rng_key is None:
        rng_key = jax.random.PRNGKey(0)
    out2d = residual_dropout_add(x2d, sub, p=float(dropout_p), key=rng_key,
                                 training=training)                  # Pallas kernel (train)
    return out2d.reshape(B, S, F)


# ---------------------------------------------------------------------------
# Pure-JAX reference (eval mode: dropout == identity)
# ---------------------------------------------------------------------------
def _reference(x, sublayer, alpha, bias, eps=1e-6):
    mean = jnp.mean(x, axis=-1, keepdims=True)
    var = jnp.sum((x - mean) ** 2, axis=-1, keepdims=True) / (x.shape[-1] - 1)
    std = jnp.sqrt(var)
    normed = alpha * (x - mean) / (std + eps) + bias
    return x + sublayer(normed)


if __name__ == "__main__":
    B, S, F = 2, 8, 32
    key = jax.random.PRNGKey(0)
    kx, kw, kdrop = jax.random.split(key, 3)

    x = jax.random.normal(kx, (B, S, F), dtype=jnp.float32)

    # Module parameters as in __init__: ones / zeros.
    alpha = jnp.ones((F,), dtype=jnp.float32)
    bias = jnp.zeros((F,), dtype=jnp.float32)

    # Example deterministic sublayer: a linear projection (plain-JAX glue,
    # since `sublayer` is an arbitrary callable argument to forward()).
    W = jax.random.normal(kw, (F, F), dtype=jnp.float32) * (1.0 / jnp.sqrt(F))
    sublayer = lambda h: jnp.einsum("bsf,fg->bsg", h, W)

    dropout_p = 0.1

    # Eval-mode run (dropout == identity) — check against the JAX reference.
    fwd_eval = jax.jit(lambda xx: residual_connection(
        xx, sublayer, alpha, bias, dropout_p=dropout_p, training=False))
    out_eval = fwd_eval(x)
    jax.block_until_ready(out_eval)
    ref = _reference(x, sublayer, alpha, bias)
    assert jnp.allclose(out_eval, ref, atol=1e-4, rtol=1e-4), "mismatch vs reference"

    # Training-mode run exercises the dropout + residual-add Pallas kernel.
    fwd_train = jax.jit(lambda xx, kk: residual_connection(
        xx, sublayer, alpha, bias, dropout_p=dropout_p, training=True, rng_key=kk))
    out_train = fwd_train(x, kdrop)
    jax.block_until_ready(out_train)
    assert out_train.shape == (B, S, F)
    assert bool(jnp.all(jnp.isfinite(out_train)))

    print("KERNEL_OK")
</pallas_src>

<mosaic_0001>
module attributes {stable_mosaic.version = 11 : i64} {
  func.func @_layernorm_kernel(%arg0: i32, %arg1: memref<16x32xf32, #tpu.memory_space<vmem>>, %arg2: memref<1x32xf32, #tpu.memory_space<vmem>>, %arg3: memref<1x32xf32, #tpu.memory_space<vmem>>, %arg4: memref<16x32xf32, #tpu.memory_space<vmem>>) attributes {dimension_semantics = [#tpu.dimension_semantics<parallel>], iteration_bounds = array<i64: 1>, scalar_prefetch = 0 : i64, scratch_operands = 0 : i64, tpu.core_type = #tpu.core_type<tc>, window_params = [{transform_indices = @transform_0, window_bounds = array<i64: 16, 32>}, {pipeline_mode = #tpu.pipeline_mode<synchronous>, transform_indices = @transform_1, window_bounds = array<i64: 1, 32>}, {pipeline_mode = #tpu.pipeline_mode<synchronous>, transform_indices = @transform_2, window_bounds = array<i64: 1, 32>}, {transform_indices = @transform_3, window_bounds = array<i64: 16, 32>}]} {
    %c0 = arith.constant 0 : index
    %c0_0 = arith.constant 0 : index
    %0 = vector.load %arg1[%c0, %c0_0] : memref<16x32xf32, #tpu.memory_space<vmem>>, vector<16x32xf32>
    %cst = arith.constant dense<0.000000e+00> : vector<16xf32>
    %1 = vector.multi_reduction <add>, %0, %cst [1] : vector<16x32xf32> to vector<16xf32>
    %2 = vector.shape_cast %1 : vector<16xf32> to vector<16x1xf32>
    %cst_1 = arith.constant 3.200000e+01 : f32
    %3 = vector.broadcast %cst_1 : f32 to vector<16x1xf32>
    %4 = arith.divf %2, %3 : vector<16x1xf32>
    %5 = vector.broadcast %4 : vector<16x1xf32> to vector<16x32xf32>
    %6 = arith.subf %0, %5 : vector<16x32xf32>
    %7 = arith.mulf %6, %6 : vector<16x32xf32>
    %cst_2 = arith.constant dense<0.000000e+00> : vector<16xf32>
    %8 = vector.multi_reduction <add>, %7, %cst_2 [1] : vector<16x32xf32> to vector<16xf32>
    %9 = vector.shape_cast %8 : vector<16xf32> to vector<16x1xf32>
    %cst_3 = arith.constant 0.0322580636 : f32
    %10 = vector.broadcast %cst_3 : f32 to vector<16x1xf32>
    %11 = arith.mulf %9, %10 : vector<16x1xf32>
    %12 = math.sqrt %11 : vector<16x1xf32>
    %cst_4 = arith.constant 9.99999997E-7 : f32
    %13 = vector.broadcast %cst_4 : f32 to vector<16x1xf32>
    %14 = arith.addf %12, %13 : vector<16x1xf32>
    %cst_5 = arith.constant 1.000000e+00 : f32
    %15 = vector.broadcast %cst_5 : f32 to vector<16x1xf32>
    %16 = arith.divf %15, %14 : vector<16x1xf32>
    %c0_6 = arith.constant 0 : index
    %c0_7 = arith.constant 0 : index
    %17 = vector.load %arg2[%c0_6, %c0_7] : memref<1x32xf32, #tpu.memory_space<vmem>>, vector<1x32xf32>
    %18 = vector.broadcast %17 : vector<1x32xf32> to vector<16x32xf32>
    %19 = vector.broadcast %16 : vector<16x1xf32> to vector<16x32xf32>
    %20 = arith.mulf %18, %19 : vector<16x32xf32>
    %21 = arith.mulf %6, %20 : vector<16x32xf32>
    %c0_8 = arith.constant 0 : index
    %c0_9 = arith.constant 0 : index
    %22 = vector.load %arg3[%c0_8, %c0_9] : memref<1x32xf32, #tpu.memory_space<vmem>>, vector<1x32xf32>
    %23 = vector.broadcast %22 : vector<1x32xf32> to vector<16x32xf32>
    %24 = arith.addf %21, %23 : vector<16x32xf32>
    %c0_10 = arith.constant 0 : index
    %c0_11 = arith.constant 0 : index
    %25 = vector.load %arg4[%c0_10, %c0_11] : memref<16x32xf32, #tpu.memory_space<vmem>>, vector<16x32xf32>
    tpu.vector_store %arg4[%c0_10, %c0_11], %24 {strides = array<i32>} : memref<16x32xf32, #tpu.memory_space<vmem>>, vector<16x32xf32>,
    return
  }
  func.func @transform_0(%arg0: i32) -> (i32, i32) {
    %c0_i32 = arith.constant 0 : i32
    %c0_i32_0 = arith.constant 0 : i32
    return %arg0, %c0_i32 : i32, i32
  }
  func.func @transform_1(%arg0: i32) -> (i32, i32) {
    %c0_i32 = arith.constant 0 : i32
    %c0_i32_0 = arith.constant 0 : i32
    %c0_i32_1 = arith.constant 0 : i32
    return %c0_i32, %c0_i32_0 : i32, i32
  }
  func.func @transform_2(%arg0: i32) -> (i32, i32) {
    %c0_i32 = arith.constant 0 : i32
    %c0_i32_0 = arith.constant 0 : i32
    %c0_i32_1 = arith.constant 0 : i32
    return %c0_i32, %c0_i32_0 : i32, i32
  }
  func.func @transform_3(%arg0: i32) -> (i32, i32) {
    %c0_i32 = arith.constant 0 : i32
    %c0_i32_0 = arith.constant 0 : i32
    return %arg0, %c0_i32 : i32, i32
  }
}

</mosaic_0001>

<bundles_post_ra>
// kernel: _lambda_.1
= control target key start
LH: loop header
LB: loop body
LE: loop exit
PB: predicated region body
PF: predicated region fallthrough
CT: control target
= control target key end

     0   :  { %8 = vsyncpa [#allocation3], 0  ;;  %s339_s0 = inlined_call_operand.hbm [shape: f32[16,32], index: 0, kind: input, shape index: {}]   ;;  %s340_s1 = inlined_call_operand.hbm [shape: f32[1,32], index: 1, kind: input, shape index: {}]   ;;  %s341_s2 = inlined_call_operand.hbm [shape: f32[1,32], index: 2, kind: input, shape index: {}]   ;;  %s342_s3 = inlined_call_operand.hbm [shape: f32[16,32], index: 3, kind: output, shape index: {}]  }
   0x1   :  { %9 = vsyncpa [#allocation6], 0 }
   0x2   :  { %10 = vsyncpa [#allocation4], 0  ;;  %s246_s12 = smov [#allocation5]   ;;  %s247_s14 = smov [#allocation2]  }
   0x3   :  { %s29_s13 = sshll.u32 %s246_s12, 4  ;;  %s16_s15 = sshll.u32 %s247_s14, 4  ;;  %s30_s13 = int_to_ptr.vmem [resolvable:$true] %s29_s13  ;;  %s272_s15 = int_to_ptr.vmem [resolvable:$true] %s16_s15 }
   0x4   :  { %s152_s18 = scalar_lea.hbm %s340_s1, 16 }
   0x5   :  { %p153_p0 = scmp.ne.s32.totalorder %s340_s1, %s152_s18  ;;  %p156_p1 = scmp.lt.u32.totalorder %s152_s18, %s340_s1 }
   0x7   :  { %p158_p2 = pnand %p156_p1, %p153_p0 }
   0x9   :  { %161 = shalt.err (!%p158_p2)
}
   0xa   :  { %s162_s23 = scalar_lea.vmem %s30_s13, 16  ;;  %s166_s24 = scalar_lea.vmem %s30_s13, 32 }
   0xb   :  { %p163_p3 = scmp.ne.s32.totalorder %s30_s13, %s162_s23  ;;  %p167_p4 = scmp.lt.s32.totalorder %s30_s13, %s30_s13 }
   0xc   :  { %p168_p5 = scmp.lt.s32.totalorder %s166_s24, %s162_s23 }
   0xe   :  { %p169_p6 = por %p168_p5, %p167_p4 }
  0x10   :  { %p170_p7 = pnand %p169_p6, %p163_p3 }
  0x12   :  { %173 = shalt.err (!%p170_p7)
}
  0x13   :  { %32 = dma.hbm_to_vmem [thread:$0]  %s340_s1, 16, %s30_s13, [#allocation6]  }
  0x14   :  { %s174_s29 = scalar_lea.hbm %s339_s0, 256 }
  0x15   :  { %p175_p8 = scmp.ne.s32.totalorder %s339_s0, %s174_s29  ;;  %p178_p9 = scmp.lt.u32.totalorder %s174_s29, %s339_s0 }
  0x17   :  { %p180_p10 = pnand %p178_p9, %p175_p8 }
  0x19   :  { %183 = shalt.err (!%p180_p10)
}
  0x1a   :  { %s184_s7 = scalar_lea.vmem %s272_s15, 256  ;;  %p189_p12 = scmp.lt.s32.totalorder %s272_s15, %s272_s15 }
  0x1b   :  { %p185_p11 = scmp.ne.s32.totalorder %s272_s15, %s184_s7  ;;  %p190_p13 = scmp.lt.s32.totalorder %s184_s7, %s184_s7 }
  0x1d   :  { %p191_p0 = por %p190_p13, %p189_p12 }
  0x1f   :  { %p192_p1 = pnand %p191_p0, %p185_p11 }
  0x21   :  { %195 = shalt.err (!%p192_p1)
}
  0x22   :  { %s248_s1 = smov 128   ;;  %s249_s8 = smov 8  }
  0x23   :  { %22 = dma.hbm_to_vmem [thread:$0]  %s339_s0, 256, %s272_s15, [#allocation3], %s248_s1, %s248_s1, %s249_s8  }
  0x24   :  { %s250_s11 = smov [#allocation7]   ;;  %s196_s16 = scalar_lea.hbm %s341_s2, 16 }
  0x25   :  { %s39_s12 = sshll.u32 %s250_s11, 4  ;;  %p197_p2 = scmp.ne.s32.totalorder %s341_s2, %s196_s16  ;;  %s40_s12 = int_to_ptr.vmem [resolvable:$true] %s39_s12 }
  0x26   :  { %p200_p3 = scmp.lt.u32.totalorder %s196_s16, %s341_s2 }
  0x28   :  { %p202_p4 = pnand %p200_p3, %p197_p2 }
  0x2a   :  { %205 = shalt.err (!%p202_p4)
}
  0x2b   :  { %s206_s21 = scalar_lea.vmem %s40_s12, 16  ;;  %s210_s0 = scalar_lea.vmem %s40_s12, 32 }
  0x2c   :  { %p207_p5 = scmp.ne.s32.totalorder %s40_s12, %s206_s21  ;;  %p211_p6 = scmp.lt.s32.totalorder %s40_s12, %s40_s12 }
  0x2d   :  { %p212_p7 = scmp.lt.s32.totalorder %s210_s0, %s206_s21 }
  0x2f   :  { %p213_p8 = por %p212_p7, %p211_p6 }
  0x31   :  { %p214_p9 = pnand %p213_p8, %p207_p5 }
  0x33   :  { %217 = shalt.err (!%p214_p9)
}
  0x34   :  { %42 = dma.hbm_to_vmem [thread:$0]  %s341_s2, 16, %s40_s12, [#allocation6]  }
  0x35   :  { %240 = dma.done.wait [#allocation3], 256  }
  0x36   :  { %241 = vsyncadd [#allocation3], 4294967040 }
  0x37   :  { %242 = dma.done.wait [#allocation6], 32  }
  0x38   :  { %243 = vsyncadd [#allocation6], 4294967264  ;;  %vm54_vm0 = vcmask 261120   ;;  %v52_v0 = vld [vmem:[#allocation2] sm:$0xff]  ;;  %v53_v1 = vld [vmem:[#allocation2 + $0x8] sm:$0xff]  ;;  %s251_s2 = smov [#allocation8]  }
  0x39   :  { %v55_v2 = vsel %vm54_vm0, %v52_v0, 0.0  ;;  %v58_v3 = vsel %vm54_vm0, %v53_v1, 0.0  ;;  %v136_v30 = vld [vmem:[#allocation5] ss:$0 sm:$0xff]  ;;  %v137_v33 = vld [vmem:[#allocation7] ss:$0 sm:$0xff] }
  0x3a   :  { %56 = vadd.xlane.f32.xlu0 %v55_v2  ;;  %s123_s23 = sshll.u32 %s251_s2, 4  ;;  %s124_s23 = int_to_ptr.vmem [resolvable:$true] %s123_s23 }
  0x3b   :  { %s218_s24 = scalar_lea.vmem %s124_s23, 256  ;;  %p223_p11 = scmp.lt.s32.totalorder %s124_s23, %s124_s23 }
  0x3c   :  { %p219_p10 = scmp.ne.s32.totalorder %s124_s23, %s218_s24  ;;  %p224_p12 = scmp.lt.s32.totalorder %s218_s24, %s218_s24 }
  0x3e   :  { %59 = vadd.xlane.f32.xlu0 %v58_v3  ;;  %p225_p13 = por %p224_p12, %p223_p11 }
  0x40   :  { %p226_p0 = pnand %p225_p13, %p219_p10 }
  0xc7   :  { %v57_v4 = vpop.xlane.xlu0 %56 }
  0xc8   :  { %v62_v5 = vmul.f32 0.03125, %v57_v4 }
  0xca   :  { %v64_v6 = vsub.f32 %v52_v0, %v62_v5 }
  0xcb   :  { %v60_v7 = vpop.xlane.xlu0 %59 }
  0xcc   :  { %v63_v8 = vmul.f32 0.03125, %v60_v7  ;;  %v66_v9 = vmul.f32 %v64_v6, %v64_v6 }
  0xce   :  { %v65_v10 = vsub.f32 %v53_v1, %v63_v8  ;;  %v68_v11 = vsel %vm54_vm0, %v66_v9, 0.0 }
  0xcf   :  { %69 = vadd.xlane.f32.xlu1 %v68_v11 }
  0xd0   :  { %v67_v12 = vmul.f32 %v65_v10, %v65_v10 }
  0xd2   :  { %v71_v13 = vsel %vm54_vm0, %v67_v12, 0.0 }
  0xd3   :  { %72 = vadd.xlane.f32.xlu1 %v71_v13 }
 0x15c   :  { %v70_v14 = vpop.xlane.xlu1 %69 }
 0x15d   :  { %v74_v15 = vmul.f32 0.032258064, %v70_v14 }
 0x15f   :  { %144 = vrsqrt.f32 %v74_v15  ;;  %vm78_vm1 = vcmp.eq.f32.partialorder %v74_v15, inf  ;;  %v81_v20 = vand.u32 2147483648, %v74_v15  ;;  %vm80_vm2 = vcmp.eq.f32.partialorder %v74_v15, 0.0 }
 0x160   :  { %v73_v16 = vpop.xlane.xlu1 %72 }
 0x161   :  { %v75_v17 = vmul.f32 0.032258064, %v73_v16 }
 0x163   :  { %146 = vrsqrt.f32 %v75_v17  ;;  %vm85_vm3 = vcmp.eq.f32.partialorder %v75_v17, inf  ;;  %v88_v26 = vand.u32 2147483648, %v75_v17  ;;  %vm87_vm4 = vcmp.eq.f32.partialorder %v75_v17, 0.0 }
 0x169   :  { %v145_v18 = vpop.eup %144 }
 0x16a   :  { %v77_v19 = vmul.f32 %v145_v18, %v74_v15 }
 0x16c   :  { %v79_v21 = vsel %vm78_vm1, %v74_v15, %v77_v19 }
 0x16d   :  { %v147_v22 = vpop.eup %146  ;;  %v82_v23 = vsel %vm80_vm2, %v81_v20, %v79_v21 }
 0x16e   :  { %v90_v24 = vadd.f32 1e-06, %v82_v23  ;;  %v84_v25 = vmul.f32 %v147_v22, %v75_v17 }
 0x170   :  { %148 = vrcp.f32 %v90_v24  ;;  %v86_v27 = vsel %vm85_vm3, %v75_v17, %v84_v25 }
 0x171   :  { %v89_v28 = vsel %vm87_vm4, %v88_v26, %v86_v27 }
 0x172   :  { %v91_v29 = vadd.f32 1e-06, %v89_v28 }
 0x174   :  { %150 = vrcp.f32 %v91_v29 }
 0x17a   :  { %v149_v31 = vpop.eup %148 }
 0x17b   :  { %v103_v32 = vmul.f32 %v149_v31, %v136_v30 }
 0x17d   :  { %v105_v34 = vmul.f32 %v103_v32, %v64_v6 }
 0x17e   :  { %v151_v35 = vpop.eup %150 }
 0x17f   :  { %v104_v36 = vmul.f32 %v151_v35, %v136_v30  ;;  %v114_v37 = vadd.f32 %v137_v33, %v105_v34 }
 0x181   :  { %v106_v38 = vmul.f32 %v104_v36, %v65_v10  ;;  %116 = vst.msk [vmem:[#allocation8] sm:$0xff] %vm54_vm0, %v114_v37 }
 0x183   :  { %v115_v39 = vadd.f32 %v137_v33, %v106_v38 }
 0x185   :  { %117 = vst.msk [vmem:[#allocation8 + $0x8] sm:$0xff] %vm54_vm0, %v115_v39 }
 0x186   :  { %229 = shalt.err (!%p226_p0)
}
 0x187   :  { %s230_s27 = scalar_lea.hbm %s342_s3, 256 }
 0x188   :  { %p231_p1 = scmp.ne.s32.totalorder %s342_s3, %s230_s27  ;;  %p234_p2 = scmp.lt.u32.totalorder %s230_s27, %s342_s3 }
 0x18a   :  { %p236_p3 = pnand %p234_p2, %p231_p1 }
 0x18c   :  { %239 = shalt.err (!%p236_p3)
}
 0x18d   :  { %129 = dma.vmem_to_hbm [thread:$0]  %s124_s23, 256, %s342_s3, [#allocation4], %s248_s1, %s248_s1, %s249_s8  }
 0x18e   :  { %244 = dma.done.wait [#allocation4], 256  }
 0x18f   :  { %245 = vsyncadd [#allocation4], 4294967040 }
 0x190   :  { %133 = vsyncpa [#allocation3], 1 }
 0x191   :  { %134 = vsyncpa [#allocation6], 1 }
 0x192   :  { %135 = vsyncpa [#allocation4], 1 }

</bundles_post_ra>
